<compile_context>
chip_gen: v6e
topology: v6e:2x2x1
jax: 0.10.0
libtpu: 0.0.40
codegen_flags: <defaults>
</compile_context>

<pallas_src>
import functools

import jax
import jax.numpy as jnp
from jax.experimental import pallas as pl
from jax.experimental.pallas import tpu as pltpu

LANE = 128


def _round_up(x, m):
    return (x + m - 1) // m * m


@functools.lru_cache(maxsize=1)
def _vmem_limit_bytes():
    """~75% of physical VMEM: ~48 MiB on v7x (64 MiB), ~96 MiB on v5e/v6e (128 MiB)."""
    cap = 64 * 1024 * 1024  # conservative fallback (safe on every generation)
    try:
        info = pltpu.get_tpu_info()
        cap = int(getattr(info, "vmem_capacity_bytes", cap) or cap)
    except Exception:
        pass
    return max(32 * 1024 * 1024, min(cap * 3 // 4, 100 * 1024 * 1024))


def _choose_row_tile(M, K, Cp, vmem_limit):
    """Largest 128-multiple row tile whose double-buffered blocks fit the VMEM
    budget while still giving several grid steps (pipelining / 2 v7x TCs)."""
    def per_step_bytes(tm):
        streamed = tm * K * 2 + tm * Cp * 4          # bf16 patches in, f32 out
        resident = K * Cp * 2 + 3 * Cp * 4           # weights + scale/shift/mask
        return 2 * streamed + resident               # double-buffered streams
    budget = int(vmem_limit * 0.6)
    cands = [t for t in (2048, 1024, 512, 256, 128) if per_step_bytes(t) <= budget]
    if not cands:
        cands = [128]
    for min_steps in (8, 4, 2, 1):
        for t in cands:                              # descending: biggest first
            if pl.cdiv(M, t) >= min_steps:
                return t
    return cands[-1]


# ---------------- Pallas kernel: lane-dense matmul + affine (+ selective ReLU) --------
def _matmul_affine_kernel(p_ref, w_ref, scale_ref, shift_ref, rmask_ref, o_ref):
    y = jnp.dot(p_ref[...], w_ref[...], preferred_element_type=jnp.float32)
    y = y * scale_ref[...] + shift_ref[...]
    o_ref[...] = jnp.where(rmask_ref[...] != 0.0, jnp.maximum(y, 0.0), y).astype(o_ref.dtype)


def matmul_affine(patches, weight2d, scale, shift, relu_mask, out_dtype=jnp.float32):
    """out[M, Cout] = epilogue( patches[M, K] @ weight2d[K, Cout] ), lane-dense padded,
    row-tiled grid, bf16 operands with f32 accumulation."""
    M, K = patches.shape
    Cout = weight2d.shape[1]
    Cp = _round_up(max(Cout, LANE), LANE)            # lane-dense (unmasked vst) output
    Kp = _round_up(K, 16)                            # sublane-aligned contraction dim

    vmem_limit = _vmem_limit_bytes()
    TM = _choose_row_tile(M, Kp, Cp, vmem_limit)
    Mp = _round_up(M, TM)

    p = patches.astype(jnp.bfloat16)
    if Mp != M or Kp != K:
        p = jnp.pad(p, ((0, Mp - M), (0, Kp - K)))   # single pad (rows + K)
    w = jnp.pad(weight2d, ((0, Kp - K), (0, Cp - Cout))).astype(jnp.bfloat16)
    scale_p = jnp.pad(scale.astype(jnp.float32), (0, Cp - Cout)).reshape(1, Cp)
    shift_p = jnp.pad(shift.astype(jnp.float32), (0, Cp - Cout)).reshape(1, Cp)
    rmask_p = jnp.pad(relu_mask.astype(jnp.float32), (0, Cp - Cout)).reshape(1, Cp)

    out_itemsize = jnp.dtype(out_dtype).itemsize
    cost = pl.CostEstimate(
        flops=2 * Mp * Kp * Cp,
        transcendentals=0,
        bytes_accessed=Mp * Kp * 2 + Kp * Cp * 2 + Mp * Cp * out_itemsize)

    out = pl.pallas_call(
        _matmul_affine_kernel,
        out_shape=jax.ShapeDtypeStruct((Mp, Cp), out_dtype),
        grid=(Mp // TM,),
        in_specs=[
            pl.BlockSpec((TM, Kp), lambda i: (i, 0)),
            pl.BlockSpec((Kp, Cp), lambda i: (0, 0)),
            pl.BlockSpec((1, Cp), lambda i: (0, 0)),
            pl.BlockSpec((1, Cp), lambda i: (0, 0)),
            pl.BlockSpec((1, Cp), lambda i: (0, 0)),
        ],
        out_specs=pl.BlockSpec((TM, Cp), lambda i: (i, 0)),
        compiler_params=pltpu.CompilerParams(
            dimension_semantics=("parallel",),
            vmem_limit_bytes=vmem_limit),
        cost_estimate=cost,
    )(p, w, scale_p, shift_p, rmask_p)
    return out[:M, :Cout]


# --------------------------- 3x3 conv = im2col + one matmul ---------------------------
def conv3x3_nhwc(x, weight, scale, shift, relu_mask, out_dtype=jnp.float32):
    """3x3 conv (stride 1, pad 1), NHWC, fused per-channel affine + optional ReLU.

    x:       [N, H, W, Cin] float32
    weight:  [Cout, Cin, 3, 3] (PyTorch layout)
    scale, shift, relu_mask: [Cout]
    returns: [N, H, W, Cout]
    """
    N, H, W, Cin = x.shape
    Cout = weight.shape[0]
    # single spatial pad, cast to bf16 once (halves downstream im2col / DMA bytes)
    xpad = jnp.pad(x.astype(jnp.bfloat16), ((0, 0), (1, 1), (1, 1), (0, 0)))
    # wrapper-side im2col -> lane-dense K = 9*Cin LHS for a single MXU matmul per tile
    cols = [xpad[:, i:i + H, j:j + W, :] for i in range(3) for j in range(3)]
    patches = jnp.concatenate(cols, axis=-1).reshape(N * H * W, 9 * Cin)
    w2d = jnp.transpose(weight, (2, 3, 1, 0)).reshape(9 * Cin, Cout)
    y = matmul_affine(patches, w2d, scale, shift, relu_mask, out_dtype=out_dtype)
    return y.reshape(N, H, W, Cout)


# ------------------------------- deformable conv -------------------------------------
def _bilinear_sample_one(img_bf16, ys, xs):
    # img: [H, W, C] bf16; ys/xs: [9, H, W] f32 sample coords; zero outside the image.
    H, W, C = img_bf16.shape
    flat = img_bf16.reshape(H * W, C)
    y0 = jnp.floor(ys)
    x0 = jnp.floor(xs)
    wy1, wx1 = ys - y0, xs - x0
    wy0, wx0 = 1.0 - wy1, 1.0 - wx1
    cy = jnp.stack([y0, y0, y0 + 1.0, y0 + 1.0], axis=0)            # [4, 9, H, W]
    cx = jnp.stack([x0, x0 + 1.0, x0, x0 + 1.0], axis=0)
    cw = jnp.stack([wy0 * wx0, wy0 * wx1, wy1 * wx0, wy1 * wx1], axis=0)
    valid = ((cy >= 0) & (cy <= H - 1) & (cx >= 0) & (cx <= W - 1)).astype(jnp.float32)
    yi = jnp.clip(cy, 0, H - 1).astype(jnp.int32)
    xi = jnp.clip(cx, 0, W - 1).astype(jnp.int32)
    idx = (yi * W + xi).reshape(-1)
    vals = jnp.take(flat, idx, axis=0).reshape(4, 9, H, W, C).astype(jnp.float32)
    return jnp.sum(vals * (cw * valid)[..., None], axis=0)          # [9, H, W, C] f32


def deform_conv3x3_nhwc(x, offset, weight):
    """torchvision deform_conv2d semantics (offset_groups=1, no mask, no bias,
    stride=1, pad=1, dil=1). The channel reduction runs in the lane-dense Pallas
    matmul kernel; the bilinear gather stays in XLA.
    TODO(synk): fuse the 4x9 neighbor gather + weighted sum into a Pallas kernel
    (keep the image tile in VMEM with scalar-prefetched indices)."""
    N, H, W, Cin = x.shape
    Cout = weight.shape[0]
    off = offset.reshape(N, H, W, 9, 2)                             # [..., k, (dy, dx)]
    dy = jnp.transpose(off[..., 0], (0, 3, 1, 2))                   # [N, 9, H, W]
    dx = jnp.transpose(off[..., 1], (0, 3, 1, 2))
    ky, kx = jnp.meshgrid(jnp.arange(3), jnp.arange(3), indexing="ij")
    ky = ky.reshape(9, 1, 1).astype(jnp.float32)
    kx = kx.reshape(9, 1, 1).astype(jnp.float32)
    gy = jnp.arange(H, dtype=jnp.float32)[None, :, None]
    gx = jnp.arange(W, dtype=jnp.float32)[None, None, :]
    ys = (gy + ky - 1.0)[None] + dy                                 # [N, 9, H, W]
    xs = (gx + kx - 1.0)[None] + dx
    sampled = jax.vmap(_bilinear_sample_one)(x.astype(jnp.bfloat16), ys, xs)
    patches = jnp.transpose(sampled, (0, 2, 3, 1, 4)).reshape(N * H * W, 9 * Cin)
    patches = patches.astype(jnp.bfloat16)                          # bf16 im2col slab
    w2d = jnp.transpose(weight, (2, 3, 1, 0)).reshape(9 * Cin, Cout)
    ones = jnp.ones((Cout,), jnp.float32)
    zeros = jnp.zeros((Cout,), jnp.float32)
    y = matmul_affine(patches, w2d, ones, zeros, zeros)
    return y.reshape(N, H, W, Cout)


# ------------------------------------ module -----------------------------------------
def init_params(key, cin, cout):
    keys = jax.random.split(key, 12)

    def w(k, shape):
        return 0.1 * jax.random.normal(k, shape, jnp.float32)

    return {
        # TODO(synk): StripConv (dynamic snake conv, kernel_size=9) source unavailable;
        # stand-in is a plain 3x3 conv producing the same [N, out_channels, H, W] shape.
        "w_strip": w(keys[0], (cout, cin, 3, 3)),
        "b_strip": w(keys[1], (cout,)),
        "w1": w(keys[2], (cout, cin, 3, 3)),
        "b1": w(keys[3], (cout,)),
        "bn1_gamma": 1.0 + w(keys[4], (cout,)),
        "bn1_beta": w(keys[5], (cout,)),
        "w_off": w(keys[6], (18, cin, 3, 3)),   # 2*3*3 offset channels
        "b_off": w(keys[7], (18,)),
        "w_def": w(keys[8], (cout, cin, 3, 3)),
        "w2": w(keys[9], (cout, 3 * cout, 3, 3)),
        "b2": w(keys[10], (cout,)),
        "bn2_gamma": 1.0 + w(keys[11], (cout,)),
        "bn2_beta": jnp.zeros((cout,), jnp.float32),
    }


def double_convolution(x_nchw, params, eps=1e-5):
    """Forward pass of DoubleConvolution. Input/output are NCHW like PyTorch."""
    cout = params["w1"].shape[0]
    x = jnp.transpose(x_nchw, (0, 2, 3, 1))          # NHWC inside the module

    # Fold eval-mode BatchNorm (fresh running stats: mean=0, var=1) into scale/shift.
    # TODO(synk): if trained running stats are loaded they must be folded here instead.
    scale1 = params["bn1_gamma"] / jnp.sqrt(1.0 + eps)
    shift1 = params["b1"] * scale1 + params["bn1_beta"]

    # One fused pallas conv for the three convs that read x:
    #   channels [0, cout)        : strip_conv stand-in      (bias, no ReLU)
    #   channels [cout, 2*cout)   : first_conv -> BN -> ReLU (folded, ReLU)
    #   channels [2*cout, +18)    : deformable offset conv   (bias, no ReLU)
    # Output kept f32 so the 18 offset channels keep full precision.
    ones_c = jnp.ones((cout,), jnp.float32)
    w_cat = jnp.concatenate([params["w_strip"], params["w1"], params["w_off"]], axis=0)
    scale = jnp.concatenate([ones_c, scale1, jnp.ones((18,), jnp.float32)])
    shift = jnp.concatenate([params["b_strip"], shift1, params["b_off"]])
    rmask = jnp.concatenate([jnp.zeros((cout,), jnp.float32), ones_c,
                             jnp.zeros((18,), jnp.float32)])
    fused = conv3x3_nhwc(x, w_cat, scale, shift, rmask)    # [N, H, W, 2*cout + 18]
    offset = fused[..., 2 * cout:2 * cout + 18]

    x3 = deform_conv3x3_nhwc(x, offset, params["w_def"])

    # single lane-axis concat: [strip | first_conv] slab + deform branch
    cat = jnp.concatenate([fused[..., :2 * cout], x3], axis=-1)

    # TODO(synk): LocalCrossAttentionModule source unavailable; amp is a pass-through
    # of the concatenated features (its out_dim == 3*out_channels matches the concat).
    xa = cat

    # second_conv: Conv2d(3*cout -> cout) -> BN (folded) -> ReLU.
    scale2 = params["bn2_gamma"] / jnp.sqrt(1.0 + eps)
    shift2 = params["b2"] * scale2 + params["bn2_beta"]
    out = conv3x3_nhwc(xa, params["w2"], scale2, shift2, jnp.ones((cout,), jnp.float32))
    return jnp.transpose(out, (0, 3, 1, 2))                # back to NCHW


if __name__ == "__main__":
    key = jax.random.PRNGKey(0)
    kx, kp = jax.random.split(key)
    N, Cin, Cout, H, W = 2, 4, 8, 16, 16
    x = jax.random.normal(kx, (N, Cin, H, W), jnp.float32)
    params = init_params(kp, Cin, Cout)
    out = jax.jit(double_convolution)(x, params)
    out = jax.block_until_ready(out)
    assert out.shape == (N, Cout, H, W)
    assert bool(jnp.all(jnp.isfinite(out)))
    print("KERNEL_OK")
</pallas_src>

<mosaic_0001>
module attributes {stable_mosaic.version = 11 : i64} {
  func.func @_matmul_affine_kernel(%arg0: i32, %arg1: memref<128x48xbf16, #tpu.memory_space<vmem>>, %arg2: memref<48x128xbf16, #tpu.memory_space<vmem>>, %arg3: memref<1x128xf32, #tpu.memory_space<vmem>>, %arg4: memref<1x128xf32, #tpu.memory_space<vmem>>, %arg5: memref<1x128xf32, #tpu.memory_space<vmem>>, %arg6: memref<128x128xf32, #tpu.memory_space<vmem>>) attributes {dimension_semantics = [#tpu.dimension_semantics<parallel>], iteration_bounds = array<i64: 4>, scalar_prefetch = 0 : i64, scratch_operands = 0 : i64, tpu.core_type = #tpu.core_type<tc>, window_params = [{transform_indices = @transform_0, window_bounds = array<i64: 128, 48>}, {pipeline_mode = #tpu.pipeline_mode<synchronous>, transform_indices = @transform_1, window_bounds = array<i64: 48, 128>}, {pipeline_mode = #tpu.pipeline_mode<synchronous>, transform_indices = @transform_2, window_bounds = array<i64: 1, 128>}, {pipeline_mode = #tpu.pipeline_mode<synchronous>, transform_indices = @transform_3, window_bounds = array<i64: 1, 128>}, {pipeline_mode = #tpu.pipeline_mode<synchronous>, transform_indices = @transform_4, window_bounds = array<i64: 1, 128>}, {transform_indices = @transform_5, window_bounds = array<i64: 128, 128>}]} {
    %c0 = arith.constant 0 : index
    %c0_0 = arith.constant 0 : index
    %0 = vector.load %arg1[%c0, %c0_0] : memref<128x48xbf16, #tpu.memory_space<vmem>>, vector<128x48xbf16>
    %c0_1 = arith.constant 0 : index
    %c0_2 = arith.constant 0 : index
    %1 = vector.load %arg2[%c0_1, %c0_2] : memref<48x128xbf16, #tpu.memory_space<vmem>>, vector<48x128xbf16>
    %cst = arith.constant dense<0.000000e+00> : vector<128x128xf32>
    %2 = tpu.matmul %0, %1, %cst {dimension_numbers = #tpu.dot_dimension_numbers<[1], [0], [0], [1], [0, 0, 1, 1], [], []>} : vector<128x48xbf16>, vector<48x128xbf16>, vector<128x128xf32> -> vector<128x128xf32>
    %c0_3 = arith.constant 0 : index
    %c0_4 = arith.constant 0 : index
    %3 = vector.load %arg3[%c0_3, %c0_4] : memref<1x128xf32, #tpu.memory_space<vmem>>, vector<1x128xf32>
    %4 = vector.broadcast %3 : vector<1x128xf32> to vector<128x128xf32>
    %5 = arith.mulf %2, %4 : vector<128x128xf32>
    %c0_5 = arith.constant 0 : index
    %c0_6 = arith.constant 0 : index
    %6 = vector.load %arg4[%c0_5, %c0_6] : memref<1x128xf32, #tpu.memory_space<vmem>>, vector<1x128xf32>
    %7 = vector.broadcast %6 : vector<1x128xf32> to vector<128x128xf32>
    %8 = arith.addf %5, %7 : vector<128x128xf32>
    %c0_7 = arith.constant 0 : index
    %c0_8 = arith.constant 0 : index
    %9 = vector.load %arg5[%c0_7, %c0_8] : memref<1x128xf32, #tpu.memory_space<vmem>>, vector<1x128xf32>
    %cst_9 = arith.constant 0.000000e+00 : f32
    %10 = vector.broadcast %cst_9 : f32 to vector<1x128xf32>
    %11 = arith.cmpf one, %9, %10 : vector<1x128xf32>
    %cst_10 = arith.constant 0.000000e+00 : f32
    %12 = vector.broadcast %cst_10 : f32 to vector<128x128xf32>
    %13 = arith.maximumf %8, %12 : vector<128x128xf32>
    %14 = vector.shape_cast %11 : vector<1x128xi1> to vector<1x128xi1>
    %15 = vector.broadcast %14 : vector<1x128xi1> to vector<128x128xi1>
    %16 = arith.select %15, %13, %8 : vector<128x128xi1>, vector<128x128xf32>
    %c0_11 = arith.constant 0 : index
    %c0_12 = arith.constant 0 : index
    %17 = vector.load %arg6[%c0_11, %c0_12] : memref<128x128xf32, #tpu.memory_space<vmem>>, vector<128x128xf32>
    tpu.vector_store %arg6[%c0_11, %c0_12], %16 {strides = array<i32>} : memref<128x128xf32, #tpu.memory_space<vmem>>, vector<128x128xf32>,
    return
  }
  func.func @transform_0(%arg0: i32) -> (i32, i32) {
    %c0_i32 = arith.constant 0 : i32
    %c0_i32_0 = arith.constant 0 : i32
    return %arg0, %c0_i32 : i32, i32
  }
  func.func @transform_1(%arg0: i32) -> (i32, i32) {
    %c0_i32 = arith.constant 0 : i32
    %c0_i32_0 = arith.constant 0 : i32
    %c0_i32_1 = arith.constant 0 : i32
    return %c0_i32, %c0_i32_0 : i32, i32
  }
  func.func @transform_2(%arg0: i32) -> (i32, i32) {
    %c0_i32 = arith.constant 0 : i32
    %c0_i32_0 = arith.constant 0 : i32
    %c0_i32_1 = arith.constant 0 : i32
    return %c0_i32, %c0_i32_0 : i32, i32
  }
  func.func @transform_3(%arg0: i32) -> (i32, i32) {
    %c0_i32 = arith.constant 0 : i32
    %c0_i32_0 = arith.constant 0 : i32
    %c0_i32_1 = arith.constant 0 : i32
    return %c0_i32, %c0_i32_0 : i32, i32
  }
  func.func @transform_4(%arg0: i32) -> (i32, i32) {
    %c0_i32 = arith.constant 0 : i32
    %c0_i32_0 = arith.constant 0 : i32
    %c0_i32_1 = arith.constant 0 : i32
    return %c0_i32, %c0_i32_0 : i32, i32
  }
  func.func @transform_5(%arg0: i32) -> (i32, i32) {
    %c0_i32 = arith.constant 0 : i32
    %c0_i32_0 = arith.constant 0 : i32
    return %arg0, %c0_i32 : i32, i32
  }
}

module attributes {stable_mosaic.version = 11 : i64} {
  func.func @_matmul_affine_kernel(%arg0: i32, %arg1: memref<128x48xbf16, #tpu.memory_space<vmem>>, %arg2: memref<48x128xbf16, #tpu.memory_space<vmem>>, %arg3: memref<1x128xf32, #tpu.memory_space<vmem>>, %arg4: memref<1x128xf32, #tpu.memory_space<vmem>>, %arg5: memref<1x128xf32, #tpu.memory_space<vmem>>, %arg6: memref<128x128xf32, #tpu.memory_space<vmem>>) attributes {dimension_semantics = [#tpu.dimension_semantics<parallel>], iteration_bounds = array<i64: 4>, scalar_prefetch = 0 : i64, scratch_operands = 0 : i64, tpu.core_type = #tpu.core_type<tc>, window_params = [{transform_indices = @transform_0, window_bounds = array<i64: 128, 48>}, {pipeline_mode = #tpu.pipeline_mode<synchronous>, transform_indices = @transform_1, window_bounds = array<i64: 48, 128>}, {pipeline_mode = #tpu.pipeline_mode<synchronous>, transform_indices = @transform_2, window_bounds = array<i64: 1, 128>}, {pipeline_mode = #tpu.pipeline_mode<synchronous>, transform_indices = @transform_3, window_bounds = array<i64: 1, 128>}, {pipeline_mode = #tpu.pipeline_mode<synchronous>, transform_indices = @transform_4, window_bounds = array<i64: 1, 128>}, {transform_indices = @transform_5, window_bounds = array<i64: 128, 128>}]} {
    %c0 = arith.constant 0 : index
    %c0_0 = arith.constant 0 : index
    %0 = vector.load %arg1[%c0, %c0_0] : memref<128x48xbf16, #tpu.memory_space<vmem>>, vector<128x48xbf16>
    %c0_1 = arith.constant 0 : index
    %c0_2 = arith.constant 0 : index
    %1 = vector.load %arg2[%c0_1, %c0_2] : memref<48x128xbf16, #tpu.memory_space<vmem>>, vector<48x128xbf16>
    %cst = arith.constant dense<0.000000e+00> : vector<128x128xf32>
    %2 = tpu.matmul %0, %1, %cst {dimension_numbers = #tpu.dot_dimension_numbers<[1], [0], [0], [1], [0, 0, 1, 1], [], []>} : vector<128x48xbf16>, vector<48x128xbf16>, vector<128x128xf32> -> vector<128x128xf32>
    %c0_3 = arith.constant 0 : index
    %c0_4 = arith.constant 0 : index
    %3 = vector.load %arg3[%c0_3, %c0_4] : memref<1x128xf32, #tpu.memory_space<vmem>>, vector<1x128xf32>
    %4 = vector.broadcast %3 : vector<1x128xf32> to vector<128x128xf32>
    %5 = arith.mulf %2, %4 : vector<128x128xf32>
    %c0_5 = arith.constant 0 : index
    %c0_6 = arith.constant 0 : index
    %6 = vector.load %arg4[%c0_5, %c0_6] : memref<1x128xf32, #tpu.memory_space<vmem>>, vector<1x128xf32>
    %7 = vector.broadcast %6 : vector<1x128xf32> to vector<128x128xf32>
    %8 = arith.addf %5, %7 : vector<128x128xf32>
    %c0_7 = arith.constant 0 : index
    %c0_8 = arith.constant 0 : index
    %9 = vector.load %arg5[%c0_7, %c0_8] : memref<1x128xf32, #tpu.memory_space<vmem>>, vector<1x128xf32>
    %cst_9 = arith.constant 0.000000e+00 : f32
    %10 = vector.broadcast %cst_9 : f32 to vector<1x128xf32>
    %11 = arith.cmpf one, %9, %10 : vector<1x128xf32>
    %cst_10 = arith.constant 0.000000e+00 : f32
    %12 = vector.broadcast %cst_10 : f32 to vector<128x128xf32>
    %13 = arith.maximumf %8, %12 : vector<128x128xf32>
    %14 = vector.shape_cast %11 : vector<1x128xi1> to vector<1x128xi1>
    %15 = vector.broadcast %14 : vector<1x128xi1> to vector<128x128xi1>
    %16 = arith.select %15, %13, %8 : vector<128x128xi1>, vector<128x128xf32>
    %c0_11 = arith.constant 0 : index
    %c0_12 = arith.constant 0 : index
    %17 = vector.load %arg6[%c0_11, %c0_12] : memref<128x128xf32, #tpu.memory_space<vmem>>, vector<128x128xf32>
    tpu.vector_store %arg6[%c0_11, %c0_12], %16 {strides = array<i32>} : memref<128x128xf32, #tpu.memory_space<vmem>>, vector<128x128xf32>,
    return
  }
  func.func @transform_0(%arg0: i32) -> (i32, i32) {
    %c0_i32 = arith.constant 0 : i32
    %c0_i32_0 = arith.constant 0 : i32
    return %arg0, %c0_i32 : i32, i32
  }
  func.func @transform_1(%arg0: i32) -> (i32, i32) {
    %c0_i32 = arith.constant 0 : i32
    %c0_i32_0 = arith.constant 0 : i32
    %c0_i32_1 = arith.constant 0 : i32
    return %c0_i32, %c0_i32_0 : i32, i32
  }
  func.func @transform_2(%arg0: i32) -> (i32, i32) {
    %c0_i32 = arith.constant 0 : i32
    %c0_i32_0 = arith.constant 0 : i32
    %c0_i32_1 = arith.constant 0 : i32
    return %c0_i32, %c0_i32_0 : i32, i32
  }
  func.func @transform_3(%arg0: i32) -> (i32, i32) {
    %c0_i32 = arith.constant 0 : i32
    %c0_i32_0 = arith.constant 0 : i32
    %c0_i32_1 = arith.constant 0 : i32
    return %c0_i32, %c0_i32_0 : i32, i32
  }
  func.func @transform_4(%arg0: i32) -> (i32, i32) {
    %c0_i32 = arith.constant 0 : i32
    %c0_i32_0 = arith.constant 0 : i32
    %c0_i32_1 = arith.constant 0 : i32
    return %c0_i32, %c0_i32_0 : i32, i32
  }
  func.func @transform_5(%arg0: i32) -> (i32, i32) {
    %c0_i32 = arith.constant 0 : i32
    %c0_i32_0 = arith.constant 0 : i32
    return %arg0, %c0_i32 : i32, i32
  }
}

module attributes {stable_mosaic.version = 11 : i64} {
  func.func @_matmul_affine_kernel(%arg0: i32, %arg1: memref<128x224xbf16, #tpu.memory_space<vmem>>, %arg2: memref<224x128xbf16, #tpu.memory_space<vmem>>, %arg3: memref<1x128xf32, #tpu.memory_space<vmem>>, %arg4: memref<1x128xf32, #tpu.memory_space<vmem>>, %arg5: memref<1x128xf32, #tpu.memory_space<vmem>>, %arg6: memref<128x128xf32, #tpu.memory_space<vmem>>) attributes {dimension_semantics = [#tpu.dimension_semantics<parallel>], iteration_bounds = array<i64: 4>, scalar_prefetch = 0 : i64, scratch_operands = 0 : i64, tpu.core_type = #tpu.core_type<tc>, window_params = [{transform_indices = @transform_0, window_bounds = array<i64: 128, 224>}, {pipeline_mode = #tpu.pipeline_mode<synchronous>, transform_indices = @transform_1, window_bounds = array<i64: 224, 128>}, {pipeline_mode = #tpu.pipeline_mode<synchronous>, transform_indices = @transform_2, window_bounds = array<i64: 1, 128>}, {pipeline_mode = #tpu.pipeline_mode<synchronous>, transform_indices = @transform_3, window_bounds = array<i64: 1, 128>}, {pipeline_mode = #tpu.pipeline_mode<synchronous>, transform_indices = @transform_4, window_bounds = array<i64: 1, 128>}, {transform_indices = @transform_5, window_bounds = array<i64: 128, 128>}]} {
    %c0 = arith.constant 0 : index
    %c0_0 = arith.constant 0 : index
    %0 = vector.load %arg1[%c0, %c0_0] : memref<128x224xbf16, #tpu.memory_space<vmem>>, vector<128x224xbf16>
    %c0_1 = arith.constant 0 : index
    %c0_2 = arith.constant 0 : index
    %1 = vector.load %arg2[%c0_1, %c0_2] : memref<224x128xbf16, #tpu.memory_space<vmem>>, vector<224x128xbf16>
    %cst = arith.constant dense<0.000000e+00> : vector<128x128xf32>
    %2 = tpu.matmul %0, %1, %cst {dimension_numbers = #tpu.dot_dimension_numbers<[1], [0], [0], [1], [0, 0, 1, 1], [], []>} : vector<128x224xbf16>, vector<224x128xbf16>, vector<128x128xf32> -> vector<128x128xf32>
    %c0_3 = arith.constant 0 : index
    %c0_4 = arith.constant 0 : index
    %3 = vector.load %arg3[%c0_3, %c0_4] : memref<1x128xf32, #tpu.memory_space<vmem>>, vector<1x128xf32>
    %4 = vector.broadcast %3 : vector<1x128xf32> to vector<128x128xf32>
    %5 = arith.mulf %2, %4 : vector<128x128xf32>
    %c0_5 = arith.constant 0 : index
    %c0_6 = arith.constant 0 : index
    %6 = vector.load %arg4[%c0_5, %c0_6] : memref<1x128xf32, #tpu.memory_space<vmem>>, vector<1x128xf32>
    %7 = vector.broadcast %6 : vector<1x128xf32> to vector<128x128xf32>
    %8 = arith.addf %5, %7 : vector<128x128xf32>
    %c0_7 = arith.constant 0 : index
    %c0_8 = arith.constant 0 : index
    %9 = vector.load %arg5[%c0_7, %c0_8] : memref<1x128xf32, #tpu.memory_space<vmem>>, vector<1x128xf32>
    %cst_9 = arith.constant 0.000000e+00 : f32
    %10 = vector.broadcast %cst_9 : f32 to vector<1x128xf32>
    %11 = arith.cmpf one, %9, %10 : vector<1x128xf32>
    %cst_10 = arith.constant 0.000000e+00 : f32
    %12 = vector.broadcast %cst_10 : f32 to vector<128x128xf32>
    %13 = arith.maximumf %8, %12 : vector<128x128xf32>
    %14 = vector.shape_cast %11 : vector<1x128xi1> to vector<1x128xi1>
    %15 = vector.broadcast %14 : vector<1x128xi1> to vector<128x128xi1>
    %16 = arith.select %15, %13, %8 : vector<128x128xi1>, vector<128x128xf32>
    %c0_11 = arith.constant 0 : index
    %c0_12 = arith.constant 0 : index
    %17 = vector.load %arg6[%c0_11, %c0_12] : memref<128x128xf32, #tpu.memory_space<vmem>>, vector<128x128xf32>
    tpu.vector_store %arg6[%c0_11, %c0_12], %16 {strides = array<i32>} : memref<128x128xf32, #tpu.memory_space<vmem>>, vector<128x128xf32>,
    return
  }
  func.func @transform_0(%arg0: i32) -> (i32, i32) {
    %c0_i32 = arith.constant 0 : i32
    %c0_i32_0 = arith.constant 0 : i32
    return %arg0, %c0_i32 : i32, i32
  }
  func.func @transform_1(%arg0: i32) -> (i32, i32) {
    %c0_i32 = arith.constant 0 : i32
    %c0_i32_0 = arith.constant 0 : i32
    %c0_i32_1 = arith.constant 0 : i32
    return %c0_i32, %c0_i32_0 : i32, i32
  }
  func.func @transform_2(%arg0: i32) -> (i32, i32) {
    %c0_i32 = arith.constant 0 : i32
    %c0_i32_0 = arith.constant 0 : i32
    %c0_i32_1 = arith.constant 0 : i32
    return %c0_i32, %c0_i32_0 : i32, i32
  }
  func.func @transform_3(%arg0: i32) -> (i32, i32) {
    %c0_i32 = arith.constant 0 : i32
    %c0_i32_0 = arith.constant 0 : i32
    %c0_i32_1 = arith.constant 0 : i32
    return %c0_i32, %c0_i32_0 : i32, i32
  }
  func.func @transform_4(%arg0: i32) -> (i32, i32) {
    %c0_i32 = arith.constant 0 : i32
    %c0_i32_0 = arith.constant 0 : i32
    %c0_i32_1 = arith.constant 0 : i32
    return %c0_i32, %c0_i32_0 : i32, i32
  }
  func.func @transform_5(%arg0: i32) -> (i32, i32) {
    %c0_i32 = arith.constant 0 : i32
    %c0_i32_0 = arith.constant 0 : i32
    return %arg0, %c0_i32 : i32, i32
  }
}

</mosaic_0001>

<bundles_post_ra>
// kernel: double_convolution.3
= control target key start
LH: loop header
LB: loop body
LE: loop exit
PB: predicated region body
PF: predicated region fallthrough
CT: control target
= control target key end

     0   :  { %10 = vsyncpa [#allocation3], 0  ;;  %s788_s18 = smov 0   ;;  %s942_s0 = inlined_call_operand.vmem [shape: bf16[512,48], index: 0, kind: input, shape index: {}]   ;;  %s943_s1 = inlined_call_operand.vmem [shape: bf16[48,128], index: 1, kind: input, shape index: {}]   ;;  %s944_s2 = inlined_call_operand.vmem [shape: f32[1,128], index: 2, kind: input, shape index: {}]   ;;  %s945_s3 = inlined_call_operand.vmem [shape: f32[1,128], index: 3, kind: input, shape index: {}]   ;;  %s946_s4 = inlined_call_operand.hbm [shape: f32[1,128], index: 4, kind: input, shape index: {}]   ;;  %s947_s5 = inlined_call_operand.vmem [shape: f32[512,128], index: 5, kind: output, shape index: {}]  }
   0x1 LB: > { %s614_s19 = sadd.s32 4294967295, %s754_s18   ;;  %p616_p0 = scmp.ge.s32.totalorder %s754_s18, 1  ;;  %s754_s18 = sphi %s788_s18, %s16_s18  }
   0x2   : > { %p157_p1 = scmp.lt.s32.totalorder %s754_s18, 5  ;;  %p800_p3 = scmp.eq.s32.totalorder %s614_s19, 0 }
   0x3   : > { %s756_s22 = smov [#allocation2]  }
   0x4   : > { %p796_p2 = pnand %p616_p0, %p157_p1  ;;  %s179_s23 = sshll.u32 %s756_s22, 4  ;;  %s180_s23 = int_to_ptr.vmem [resolvable:$true] %s179_s23 }
   0x5   : > { %s729_s24 = scalar_lea.vmem %s180_s23, 16  ;;  %s736_s25 = scalar_lea.vmem %s180_s23, 32 }
   0x6   : > { %p691_p4 = pneg %p796_p2  ;;  %p730_p7 = scmp.ne.s32.totalorder %s180_s23, %s729_s24 }
   0x7   : > { %p737_p10 = scmp.lt.s32.totalorder %s180_s23, %s180_s23  ;;  %p738_p11 = scmp.lt.s32.totalorder %s736_s25, %s729_s24 }
   0x8   : > { %p692_p5 = pnand %p800_p3, %p691_p4 }
   0x9   : > { %p739_p12 = por %p738_p11, %p737_p10 }
   0xa   : > { %p720_p6 = pneg %p692_p5 }
   0xc   : > { %p732_p8 = pnand %p730_p7, %p720_p6 }
   0xe   : > { %p733_p9 = pneg %p732_p8 }
  0x10   : > { %p740_p13 = pnand %p739_p12, %p733_p9 }
  0x12   : > { %743 = shalt.err (!%p740_p13)
}
  0x13   : > { %694 = dma.hbm_to_vmem [thread:$0]  (!%p692_p5), %s946_s4, 16, %s180_s23, [#allocation3]  }
  0x14   : > { %201 = sbr.rel (%p796_p2) target bundleno = 256 (0x100), region = 40 }
  0x19   : > { %749 = dma.done.wait (%p800_p3), [#allocation3], 16  }
  0x1a   : > { %751 = vsyncadd (%p800_p3), [#allocation3], 4294967280  ;;  %s621_s28 = sshll.u32 %s614_s19, 4  ;;  %v707_v0 = vld [vmem:[%s943_s1 + $0x10] sm:$0xff]   ;;  %v708_v1 = vld [vmem:[%s943_s1 + $0x8] sm:$0xff]   ;;  %vm322_vm0 = vcmask 392192   ;;  %v509_v11 = vlaneseq }
  0x1b   : > { %p230_p0 = scmp.lt.s32.totalorder %s621_s28, 63  ;;  %659 = vmatprep.subr.bf16.mxu0 %v707_v0  ;;  %681 = vmatprep.subr.bf16.mxu1 %v707_v0  ;;  %v709_v2 = vld [vmem:[%s943_s1] sm:$0xff]   ;;  %v757_v15 = vmov 0  }
  0x1c   : > { %660 = vmatpush3.bf16.msra.mxu0 %v707_v0  ;;  %684 = vmatpush3.bf16.msra.mxu1 %v707_v0  ;;  %v490_v12 = vld [vmem:[#allocation2] sm:$0x1]  ;;  %v510_v13 = vshrl.u32 %v509_v11, 7 }
  0x1d   : > { %s951_s28 = smov (!%p230_p0, %s621_s28), 63  ;;  %661 = vmatprep.subr.bf16.mxu0 %v708_v1  ;;  %682 = vmatprep.subr.bf16.mxu1 %v708_v1  ;;  %vm491_vm1 = vcmp.ne.f32.partialorder %v490_v12, 0.0  ;;  %v843_v17 = vld [vmem:[%s944_s2] ss:$0 sm:$0xff] }
  0x1e   : > { %s622_s29 = sshll.u32 %s951_s28, 2  ;;  %v511_v14 = vsub.s32 0, %v510_v13  ;;  %v508_v16 = vsel %vm491_vm1, 1, %v757_v15  ;;  %v848_v19 = vld [vmem:[%s945_s3] ss:$0 sm:$0xff]  ;;  %s624_s19 = sshll.u32 %s951_s28, 3 }
  0x1f   : > { %s233_s9 = scalar_lea.vmem %s942_s0, %s622_s29  ;;  %s863_s22 = scalar_lea.vmem %s947_s5, %s624_s19 }
  0x20   : > { %v710_v3 = vld [vmem:[%s233_s9] sm:$0xff]   ;;  %662 = vmatpush3.bf16.msra.mxu0 %v708_v1  ;;  %685 = vmatpush3.bf16.msra.mxu1 %v708_v1  ;;  %v712_v5 = vld [vmem:[%s233_s9 + $0x8] sm:$0xff]   ;;  %v714_v7 = vld [vmem:[%s233_s9 + $0x10] sm:$0xff]   ;;  %v850_v20 = vrot.slane %v508_v16, %v511_v14 }
  0x21   : > { %v711_v4 = vld [vmem:[%s233_s9 + $0x20] sm:$0xff]   ;;  %665 = vmatprep.mubr.msk.bf16.mxu0 %vm322_vm0, %v710_v3  ;;  %663 = vmatprep.subr.bf16.mxu0 %v709_v2  ;;  %v713_v6 = vld [vmem:[%s233_s9 + $0x28] sm:$0xff]   ;;  %v715_v8 = vld [vmem:[%s233_s9 + $0x30] sm:$0xff]  }
  0x22   : > { %673 = vmatprep.mubr.msk.bf16.mxu1 %vm322_vm0, %v711_v4  ;;  %683 = vmatprep.subr.bf16.mxu1 %v709_v2  ;;  %v716_v9 = vld [vmem:[%s233_s9 + $0x18] sm:$0xff]   ;;  %vm513_vm2 = vcmp.eq.s32.totalorder %v850_v20, 1 }
  0x23   : > { %v717_v10 = vld [vmem:[%s233_s9 + $0x38] sm:$0xff]  }
  0x24   : > { %664 = vmatpush3.bf16.msra.mxu0 %v709_v2  ;;  %686 = vmatpush3.bf16.msra.mxu1 %v709_v2 }
  0x27   : > { %666 = vmatmul.mubr.msk.bf16.vlgmr.msra.gmra.mxu0 %vm322_vm0, %v712_v5  ;;  %674 = vmatmul.mubr.msk.bf16.vlgmr.msra.gmra.mxu1 %vm322_vm0, %v713_v6 }
  0x28   : > { %669 = vmatprep.mubr.msk.bf16.mxu0 %vm322_vm0, %v714_v7  ;;  %677 = vmatprep.mubr.msk.bf16.mxu1 %vm322_vm0, %v715_v8 }
  0x2f   : > { %670 = vmatmul.mubr.msk.bf16.gmra.mxu0 %vm322_vm0, %v716_v9  ;;  %678 = vmatmul.mubr.msk.bf16.gmra.mxu1 %vm322_vm0, %v717_v10 }
  0xe7   : > { %v667_v18 = vpop.f32.mrf.mxu0  ;;  %v675_v21 = vpop.f32.mrf.mxu1 }
  0xe8   : > { %v453_v22 = vmul.f32 %v667_v18, %v843_v17  ;;  %v461_v23 = vmul.f32 %v675_v21, %v843_v17 }
  0xe9   : > { %v381_v24 = vpop.f32.mrf.mxu0  ;;  %v413_v25 = vpop.f32.mrf.mxu1 }
  0xea   : > { %v476_v26 = vadd.f32 %v848_v19, %v453_v22  ;;  %v484_v27 = vadd.f32 %v848_v19, %v461_v23  ;;  %v451_v28 = vmul.f32 %v843_v17, %v381_v24  ;;  %v459_v29 = vmul.f32 %v843_v17, %v413_v25 }
  0xeb   : > { %v668_v30 = vpop.f32.mrf.mxu0  ;;  %v676_v31 = vpop.f32.mrf.mxu1 }
  0xec   : > { %v494_v32 = vmax.f32 %v476_v26, 0.0  ;;  %v502_v33 = vmax.f32 %v484_v27, 0.0  ;;  %v474_v34 = vadd.f32 %v848_v19, %v451_v28  ;;  %v482_v35 = vadd.f32 %v848_v19, %v459_v29 }
  0xed   : > { %v454_v36 = vmul.f32 %v668_v30, %v843_v17  ;;  %v462_v37 = vmul.f32 %v676_v31, %v843_v17  ;;  %v384_v38 = vpop.f32.mrf.mxu0  ;;  %v416_v39 = vpop.f32.mrf.mxu1 }
  0xee   : > { %v516_v40 = vsel %vm513_vm2, %v494_v32, %v476_v26  ;;  %v524_v41 = vsel %vm513_vm2, %v502_v33, %v484_v27  ;;  %v492_v42 = vmax.f32 %v474_v34, 0.0  ;;  %v500_v43 = vmax.f32 %v482_v35, 0.0 }
  0xef   : > { %532 = vst [vmem:[%s863_s22 + $0x10] sm:$0xff] %v516_v40  ;;  %540 = vst [vmem:[%s863_s22 + $0x50] sm:$0xff] %v524_v41  ;;  %v477_v44 = vadd.f32 %v848_v19, %v454_v36  ;;  %v485_v45 = vadd.f32 %v848_v19, %v462_v37  ;;  %v452_v46 = vmul.f32 %v843_v17, %v384_v38  ;;  %v671_v48 = vpop.f32.mrf.mxu0  ;;  %v679_v49 = vpop.f32.mrf.mxu1 }
  0xf0   : > { %v460_v47 = vmul.f32 %v843_v17, %v416_v39  ;;  %v514_v50 = vsel %vm513_vm2, %v492_v42, %v474_v34  ;;  %v522_v51 = vsel %vm513_vm2, %v500_v43, %v482_v35  ;;  %v457_v52 = vmul.f32 %v671_v48, %v843_v17 }
  0xf1   : > { %v465_v53 = vmul.f32 %v679_v49, %v843_v17  ;;  %530 = vst [vmem:[%s863_s22] sm:$0xff] %v514_v50  ;;  %538 = vst [vmem:[%s863_s22 + $0x40] sm:$0xff] %v522_v51  ;;  %v495_v54 = vmax.f32 %v477_v44, 0.0  ;;  %v503_v55 = vmax.f32 %v485_v45, 0.0  ;;  %v475_v56 = vadd.f32 %v848_v19, %v452_v46  ;;  %v397_v58 = vpop.f32.mrf.mxu0  ;;  %v429_v59 = vpop.f32.mrf.mxu1 }
  0xf2   : > { %v483_v57 = vadd.f32 %v848_v19, %v460_v47  ;;  %v480_v60 = vadd.f32 %v848_v19, %v457_v52  ;;  %v455_v62 = vmul.f32 %v843_v17, %v397_v58  ;;  %v463_v63 = vmul.f32 %v843_v17, %v429_v59 }
  0xf3   : > { %v488_v61 = vadd.f32 %v848_v19, %v465_v53  ;;  %v517_v0 = vsel %vm513_vm2, %v495_v54, %v477_v44  ;;  %v525_v1 = vsel %vm513_vm2, %v503_v55, %v485_v45  ;;  %v493_v2 = vmax.f32 %v475_v56, 0.0  ;;  %v672_v4 = vpop.f32.mrf.mxu0  ;;  %v680_v5 = vpop.f32.mrf.mxu1 }
  0xf4   : > { %v501_v3 = vmax.f32 %v483_v57, 0.0  ;;  %533 = vst [vmem:[%s863_s22 + $0x18] sm:$0xff] %v517_v0  ;;  %541 = vst [vmem:[%s863_s22 + $0x58] sm:$0xff] %v525_v1  ;;  %v498_v6 = vmax.f32 %v480_v60, 0.0  ;;  %v478_v8 = vadd.f32 %v848_v19, %v455_v62  ;;  %v486_v9 = vadd.f32 %v848_v19, %v463_v63 }
  0xf5   : > { %v506_v7 = vmax.f32 %v488_v61, 0.0  ;;  %v515_v10 = vsel %vm513_vm2, %v493_v2, %v475_v56  ;;  %v458_v12 = vmul.f32 %v672_v4, %v843_v17  ;;  %v466_v13 = vmul.f32 %v680_v5, %v843_v17  ;;  %v400_v14 = vpop.f32.mrf.mxu0  ;;  %v432_v15 = vpop.f32.mrf.mxu1 }
  0xf6   : > { %v523_v11 = vsel %vm513_vm2, %v501_v3, %v483_v57  ;;  %531 = vst [vmem:[%s863_s22 + $0x8] sm:$0xff] %v515_v10  ;;  %v520_v16 = vsel %vm513_vm2, %v498_v6, %v480_v60  ;;  %v496_v21 = vmax.f32 %v478_v8, 0.0  ;;  %v504_v22 = vmax.f32 %v486_v9, 0.0 }
  0xf7   : > { %539 = vst [vmem:[%s863_s22 + $0x48] sm:$0xff] %v523_v11  ;;  %v528_v18 = vsel %vm513_vm2, %v506_v7, %v488_v61  ;;  %536 = vst [vmem:[%s863_s22 + $0x30] sm:$0xff] %v520_v16  ;;  %v481_v23 = vadd.f32 %v848_v19, %v458_v12  ;;  %v489_v24 = vadd.f32 %v848_v19, %v466_v13 }
  0xf8   : > { %544 = vst [vmem:[%s863_s22 + $0x70] sm:$0xff] %v528_v18  ;;  %v456_v25 = vmul.f32 %v843_v17, %v400_v14  ;;  %v464_v26 = vmul.f32 %v843_v17, %v432_v15  ;;  %v518_v27 = vsel %vm513_vm2, %v496_v21, %v478_v8  ;;  %v526_v28 = vsel %vm513_vm2, %v504_v22, %v486_v9 }
  0xf9   : > { %534 = vst [vmem:[%s863_s22 + $0x20] sm:$0xff] %v518_v27  ;;  %542 = vst [vmem:[%s863_s22 + $0x60] sm:$0xff] %v526_v28  ;;  %v499_v29 = vmax.f32 %v481_v23, 0.0  ;;  %v507_v30 = vmax.f32 %v489_v24, 0.0 }
  0xfa   : > { %v479_v31 = vadd.f32 %v848_v19, %v456_v25  ;;  %v487_v32 = vadd.f32 %v848_v19, %v464_v26 }
  0xfb   : > { %v521_v33 = vsel %vm513_vm2, %v499_v29, %v481_v23  ;;  %v529_v17 = vsel %vm513_vm2, %v507_v30, %v489_v24 }
  0xfc   : > { %v497_v34 = vmax.f32 %v479_v31, 0.0  ;;  %v505_v35 = vmax.f32 %v487_v32, 0.0  ;;  %537 = vst [vmem:[%s863_s22 + $0x38] sm:$0xff] %v521_v33  ;;  %545 = vst [vmem:[%s863_s22 + $0x78] sm:$0xff] %v529_v17 }
  0xfe   : > { %v519_v36 = vsel %vm513_vm2, %v497_v34, %v479_v31  ;;  %v527_v37 = vsel %vm513_vm2, %v505_v35, %v487_v32 }
  0xff   : > { %535 = vst [vmem:[%s863_s22 + $0x28] sm:$0xff] %v519_v36  ;;  %543 = vst [vmem:[%s863_s22 + $0x68] sm:$0xff] %v527_v37 }
 0x100 PF: > { %s16_s18 = sadd.s32 1, %s754_s18  }
 0x101   : > { %p13_p1 = scmp.ge.s32.totalorder %s16_s18, 6  }
 0x103   :  { %15 = sbr.rel (!%p13_p1) target bundleno = 1 (0x1), region = 75 }
 0x108   :  { %568 = vsyncpa [#allocation3], 1 }
 0x109   :  { %570 = vsyncpa [#allocation3 + $0x1], 1 }

// kernel: double_convolution.4
= control target key start
LH: loop header
LB: loop body
LE: loop exit
PB: predicated region body
PF: predicated region fallthrough
CT: control target
= control target key end

     0   :  { %s719_s18 = smov 0   ;;  %s855_s0 = inlined_call_operand.vmem [shape: bf16[512,48], index: 0, kind: input, shape index: {}]   ;;  %s856_s1 = inlined_call_operand.vmem [shape: bf16[48,128], index: 1, kind: input, shape index: {}]   ;;  %s857_s2 = inlined_call_operand.vmem [shape: f32[1,128], index: 2, kind: input, shape index: {}]   ;;  %s858_s3 = inlined_call_operand.vmem [shape: f32[1,128], index: 3, kind: input, shape index: {}, may-alias: {3,4}]   ;;  %s859_s4 = inlined_call_operand.vmem [shape: f32[1,128], index: 4, kind: input, shape index: {}, may-alias: {3,4}]   ;;  %s860_s5 = inlined_call_operand.vmem [shape: f32[512,128], index: 5, kind: output, shape index: {}]  }
   0x1 LB: > { %s589_s19 = sadd.s32 4294967295, %s686_s18   ;;  %p593_p0 = scmp.ge.s32.totalorder %s686_s18, 1  ;;  %s686_s18 = sphi %s719_s18, %s15_s18  }
   0x2   : > { %p188_p1 = scmp.lt.s32.totalorder %s686_s18, 5 }
   0x4   : > { %p189_p2 = pnand %p593_p0, %p188_p1 }
   0x5   : > { %s594_s22 = sshll.u32 (!%p189_p2), %s589_s19, 4 }
   0x6   : > { %192 = sbr.rel (%p189_p2) target bundleno = 241 (0xf1), region = 40  ;;  %p217_p3 = scmp.lt.s32.totalorder (!%p189_p2), %s594_s22, 63 }
   0xb   : > { %v669_v0 = vld [vmem:[%s856_s1 + $0x10] sm:$0xff]   ;;  %v670_v1 = vld [vmem:[%s856_s1 + $0x8] sm:$0xff]   ;;  %s862_s22 = smov (!%p217_p3, %s594_s22), 63  ;;  %v671_v2 = vld [vmem:[%s856_s1] sm:$0xff]   ;;  %vm309_vm0 = vcmask 392192   ;;  %v496_v11 = vlaneseq  ;;  %v688_v15 = vmov 0  }
   0xc   : > { %632 = vmatprep.subr.bf16.mxu0 %v669_v0  ;;  %654 = vmatprep.subr.bf16.mxu1 %v669_v0  ;;  %s595_s27 = sshll.u32 %s862_s22, 2  ;;  %v477_v12 = vld [vmem:[%s859_s4] sm:$0x1]  ;;  %s597_s12 = sshll.u32 %s862_s22, 3 }
   0xd   : > { %633 = vmatpush3.bf16.msra.mxu0 %v669_v0  ;;  %657 = vmatpush3.bf16.msra.mxu1 %v669_v0  ;;  %s220_s30 = scalar_lea.vmem %s855_s0, %s595_s27  ;;  %v497_v13 = vshrl.u32 %v496_v11, 7  ;;  %vm478_vm1 = vcmp.ne.f32.partialorder %v477_v12, 0.0  ;;  %v756_v17 = vld [vmem:[%s857_s2] ss:$0 sm:$0xff]  ;;  %s776_s15 = scalar_lea.vmem %s860_s5, %s597_s12 }
   0xe   : > { %634 = vmatprep.subr.bf16.mxu0 %v670_v1  ;;  %655 = vmatprep.subr.bf16.mxu1 %v670_v1  ;;  %v672_v3 = vld [vmem:[%s220_s30] sm:$0xff]   ;;  %v674_v5 = vld [vmem:[%s220_s30 + $0x8] sm:$0xff]   ;;  %v676_v7 = vld [vmem:[%s220_s30 + $0x10] sm:$0xff]   ;;  %v495_v16 = vsel %vm478_vm1, 1, %v688_v15 }
   0xf   : > { %v673_v4 = vld [vmem:[%s220_s30 + $0x20] sm:$0xff]   ;;  %638 = vmatprep.mubr.msk.bf16.mxu0 %vm309_vm0, %v672_v3  ;;  %v675_v6 = vld [vmem:[%s220_s30 + $0x28] sm:$0xff]   ;;  %v677_v8 = vld [vmem:[%s220_s30 + $0x30] sm:$0xff]   ;;  %v498_v14 = vsub.s32 0, %v497_v13 }
  0x10   : > { %646 = vmatprep.mubr.msk.bf16.mxu1 %vm309_vm0, %v673_v4  ;;  %v678_v9 = vld [vmem:[%s220_s30 + $0x18] sm:$0xff]   ;;  %v761_v19 = vld [vmem:[%s858_s3] ss:$0 sm:$0xff] }
  0x11   : > { %635 = vmatpush3.bf16.msra.mxu0 %v670_v1  ;;  %658 = vmatpush3.bf16.msra.mxu1 %v670_v1  ;;  %v679_v10 = vld [vmem:[%s220_s30 + $0x38] sm:$0xff]   ;;  %v763_v20 = vrot.slane %v495_v16, %v498_v14 }
  0x12   : > { %636 = vmatprep.subr.bf16.mxu0 %v671_v2  ;;  %656 = vmatprep.subr.bf16.mxu1 %v671_v2 }
  0x13   : > { %vm500_vm2 = vcmp.eq.s32.totalorder %v763_v20, 1 }
  0x15   : > { %637 = vmatpush3.bf16.msra.mxu0 %v671_v2  ;;  %659 = vmatpush3.bf16.msra.mxu1 %v671_v2 }
  0x18   : > { %639 = vmatmul.mubr.msk.bf16.vlgmr.msra.gmra.mxu0 %vm309_vm0, %v674_v5  ;;  %647 = vmatmul.mubr.msk.bf16.vlgmr.msra.gmra.mxu1 %vm309_vm0, %v675_v6 }
  0x19   : > { %642 = vmatprep.mubr.msk.bf16.mxu0 %vm309_vm0, %v676_v7  ;;  %650 = vmatprep.mubr.msk.bf16.mxu1 %vm309_vm0, %v677_v8 }
  0x20   : > { %643 = vmatmul.mubr.msk.bf16.gmra.mxu0 %vm309_vm0, %v678_v9  ;;  %651 = vmatmul.mubr.msk.bf16.gmra.mxu1 %vm309_vm0, %v679_v10 }
  0xd8   : > { %v640_v18 = vpop.f32.mrf.mxu0  ;;  %v648_v21 = vpop.f32.mrf.mxu1 }
  0xd9   : > { %v440_v22 = vmul.f32 %v640_v18, %v756_v17  ;;  %v448_v23 = vmul.f32 %v648_v21, %v756_v17 }
  0xda   : > { %v368_v24 = vpop.f32.mrf.mxu0  ;;  %v400_v25 = vpop.f32.mrf.mxu1 }
  0xdb   : > { %v463_v26 = vadd.f32 %v761_v19, %v440_v22  ;;  %v471_v27 = vadd.f32 %v761_v19, %v448_v23  ;;  %v438_v28 = vmul.f32 %v756_v17, %v368_v24  ;;  %v446_v29 = vmul.f32 %v756_v17, %v400_v25 }
  0xdc   : > { %v641_v30 = vpop.f32.mrf.mxu0  ;;  %v649_v31 = vpop.f32.mrf.mxu1 }
  0xdd   : > { %v481_v32 = vmax.f32 %v463_v26, 0.0  ;;  %v489_v33 = vmax.f32 %v471_v27, 0.0  ;;  %v461_v34 = vadd.f32 %v761_v19, %v438_v28  ;;  %v469_v35 = vadd.f32 %v761_v19, %v446_v29 }
  0xde   : > { %v441_v36 = vmul.f32 %v641_v30, %v756_v17  ;;  %v449_v37 = vmul.f32 %v649_v31, %v756_v17  ;;  %v371_v38 = vpop.f32.mrf.mxu0  ;;  %v403_v39 = vpop.f32.mrf.mxu1 }
  0xdf   : > { %v503_v40 = vsel %vm500_vm2, %v481_v32, %v463_v26  ;;  %v511_v41 = vsel %vm500_vm2, %v489_v33, %v471_v27  ;;  %v479_v42 = vmax.f32 %v461_v34, 0.0  ;;  %v487_v43 = vmax.f32 %v469_v35, 0.0 }
  0xe0   : > { %519 = vst [vmem:[%s776_s15 + $0x10] sm:$0xff] %v503_v40  ;;  %527 = vst [vmem:[%s776_s15 + $0x50] sm:$0xff] %v511_v41  ;;  %v464_v44 = vadd.f32 %v761_v19, %v441_v36  ;;  %v472_v45 = vadd.f32 %v761_v19, %v449_v37  ;;  %v439_v46 = vmul.f32 %v756_v17, %v371_v38  ;;  %v644_v48 = vpop.f32.mrf.mxu0  ;;  %v652_v49 = vpop.f32.mrf.mxu1 }
  0xe1   : > { %v447_v47 = vmul.f32 %v756_v17, %v403_v39  ;;  %v501_v50 = vsel %vm500_vm2, %v479_v42, %v461_v34  ;;  %v509_v51 = vsel %vm500_vm2, %v487_v43, %v469_v35  ;;  %v444_v52 = vmul.f32 %v644_v48, %v756_v17 }
  0xe2   : > { %v452_v53 = vmul.f32 %v652_v49, %v756_v17  ;;  %517 = vst [vmem:[%s776_s15] sm:$0xff] %v501_v50  ;;  %525 = vst [vmem:[%s776_s15 + $0x40] sm:$0xff] %v509_v51  ;;  %v482_v54 = vmax.f32 %v464_v44, 0.0  ;;  %v490_v55 = vmax.f32 %v472_v45, 0.0  ;;  %v462_v56 = vadd.f32 %v761_v19, %v439_v46  ;;  %v384_v58 = vpop.f32.mrf.mxu0  ;;  %v416_v59 = vpop.f32.mrf.mxu1 }
  0xe3   : > { %v470_v57 = vadd.f32 %v761_v19, %v447_v47  ;;  %v467_v60 = vadd.f32 %v761_v19, %v444_v52  ;;  %v442_v62 = vmul.f32 %v756_v17, %v384_v58  ;;  %v450_v63 = vmul.f32 %v756_v17, %v416_v59 }
  0xe4   : > { %v475_v61 = vadd.f32 %v761_v19, %v452_v53  ;;  %v504_v0 = vsel %vm500_vm2, %v482_v54, %v464_v44  ;;  %v512_v1 = vsel %vm500_vm2, %v490_v55, %v472_v45  ;;  %v480_v2 = vmax.f32 %v462_v56, 0.0  ;;  %v645_v4 = vpop.f32.mrf.mxu0  ;;  %v653_v5 = vpop.f32.mrf.mxu1 }
  0xe5   : > { %v488_v3 = vmax.f32 %v470_v57, 0.0  ;;  %520 = vst [vmem:[%s776_s15 + $0x18] sm:$0xff] %v504_v0  ;;  %528 = vst [vmem:[%s776_s15 + $0x58] sm:$0xff] %v512_v1  ;;  %v485_v6 = vmax.f32 %v467_v60, 0.0  ;;  %v465_v8 = vadd.f32 %v761_v19, %v442_v62  ;;  %v473_v9 = vadd.f32 %v761_v19, %v450_v63 }
  0xe6   : > { %v493_v7 = vmax.f32 %v475_v61, 0.0  ;;  %v502_v10 = vsel %vm500_vm2, %v480_v2, %v462_v56  ;;  %v445_v12 = vmul.f32 %v645_v4, %v756_v17  ;;  %v453_v13 = vmul.f32 %v653_v5, %v756_v17  ;;  %v387_v14 = vpop.f32.mrf.mxu0  ;;  %v419_v15 = vpop.f32.mrf.mxu1 }
  0xe7   : > { %v510_v11 = vsel %vm500_vm2, %v488_v3, %v470_v57  ;;  %518 = vst [vmem:[%s776_s15 + $0x8] sm:$0xff] %v502_v10  ;;  %v507_v16 = vsel %vm500_vm2, %v485_v6, %v467_v60  ;;  %v483_v21 = vmax.f32 %v465_v8, 0.0  ;;  %v491_v22 = vmax.f32 %v473_v9, 0.0 }
  0xe8   : > { %526 = vst [vmem:[%s776_s15 + $0x48] sm:$0xff] %v510_v11  ;;  %v515_v18 = vsel %vm500_vm2, %v493_v7, %v475_v61  ;;  %523 = vst [vmem:[%s776_s15 + $0x30] sm:$0xff] %v507_v16  ;;  %v468_v23 = vadd.f32 %v761_v19, %v445_v12  ;;  %v476_v24 = vadd.f32 %v761_v19, %v453_v13 }
  0xe9   : > { %531 = vst [vmem:[%s776_s15 + $0x70] sm:$0xff] %v515_v18  ;;  %v443_v25 = vmul.f32 %v756_v17, %v387_v14  ;;  %v451_v26 = vmul.f32 %v756_v17, %v419_v15  ;;  %v505_v27 = vsel %vm500_vm2, %v483_v21, %v465_v8  ;;  %v513_v28 = vsel %vm500_vm2, %v491_v22, %v473_v9 }
  0xea   : > { %521 = vst [vmem:[%s776_s15 + $0x20] sm:$0xff] %v505_v27  ;;  %529 = vst [vmem:[%s776_s15 + $0x60] sm:$0xff] %v513_v28  ;;  %v486_v29 = vmax.f32 %v468_v23, 0.0  ;;  %v494_v30 = vmax.f32 %v476_v24, 0.0 }
  0xeb   : > { %v466_v31 = vadd.f32 %v761_v19, %v443_v25  ;;  %v474_v32 = vadd.f32 %v761_v19, %v451_v26 }
  0xec   : > { %v508_v33 = vsel %vm500_vm2, %v486_v29, %v468_v23  ;;  %v516_v17 = vsel %vm500_vm2, %v494_v30, %v476_v24 }
  0xed   : > { %v484_v34 = vmax.f32 %v466_v31, 0.0  ;;  %v492_v35 = vmax.f32 %v474_v32, 0.0  ;;  %524 = vst [vmem:[%s776_s15 + $0x38] sm:$0xff] %v508_v33  ;;  %532 = vst [vmem:[%s776_s15 + $0x78] sm:$0xff] %v516_v17 }
  0xef   : > { %v506_v36 = vsel %vm500_vm2, %v484_v34, %v466_v31  ;;  %v514_v37 = vsel %vm500_vm2, %v492_v35, %v474_v32 }
  0xf0   : > { %522 = vst [vmem:[%s776_s15 + $0x28] sm:$0xff] %v506_v36  ;;  %530 = vst [vmem:[%s776_s15 + $0x68] sm:$0xff] %v514_v37 }
  0xf1 PF: > { %s15_s18 = sadd.s32 1, %s686_s18  }
  0xf2   : > { %p12_p4 = scmp.ge.s32.totalorder %s15_s18, 6  }
  0xf4   :  { %14 = sbr.rel (!%p12_p4) target bundleno = 1 (0x1), region = 70 }

// kernel: double_convolution.5
= control target key start
LH: loop header
LB: loop body
LE: loop exit
PB: predicated region body
PF: predicated region fallthrough
CT: control target
= control target key end

     0   :  { %s879_s18 = smov 0   ;;  %s1098_s0 = inlined_call_operand.vmem [shape: bf16[512,224], index: 0, kind: input, shape index: {}]   ;;  %s1099_s1 = inlined_call_operand.vmem [shape: bf16[224,128], index: 1, kind: input, shape index: {}]   ;;  %s1100_s2 = inlined_call_operand.vmem [shape: f32[1,128], index: 2, kind: input, shape index: {}]   ;;  %s1101_s3 = inlined_call_operand.vmem [shape: f32[1,128], index: 3, kind: input, shape index: {}]   ;;  %s1102_s4 = inlined_call_operand.vmem [shape: f32[1,128], index: 4, kind: input, shape index: {}]   ;;  %s1103_s5 = inlined_call_operand.vmem [shape: f32[512,128], index: 5, kind: output, shape index: {}]  }
   0x1 LB: > { %s712_s19 = sadd.s32 4294967295, %s846_s18   ;;  %p716_p0 = scmp.ge.s32.totalorder %s846_s18, 1  ;;  %s846_s18 = sphi %s879_s18, %s15_s18  }
   0x2   : > { %p189_p1 = scmp.lt.s32.totalorder %s846_s18, 5 }
   0x4   : > { %p190_p2 = pnand %p716_p0, %p189_p1 }
   0x5   : > { %s717_s22 = sshll.u32 (!%p190_p2), %s712_s19, 4 }
   0x6   : > { %193 = sbr.rel (%p190_p2) target bundleno = 297 (0x129), region = 40  ;;  %p219_p3 = scmp.lt.s32.totalorder (!%p190_p2), %s717_s22, 63 }
   0xb   : > { %v802_v0 = vld [vmem:[%s1099_s1 + $0x38] sm:$0xff]   ;;  %v848_v1 = vmov 0   ;;  %v803_v2 = vld [vmem:[%s1099_s1 + $0x30] sm:$0xff]   ;;  %s1105_s22 = smov (!%p219_p3, %s717_s22), 63  ;;  %v804_v3 = vld [vmem:[%s1099_s1 + $0x28] sm:$0xff]   ;;  %vm432_vm0 = vcmask 785408   ;;  %v619_v31 = vlaneseq }
   0xc   : > { %457 = vmatprep.subr.bf16.mxu0 %v848_v1  ;;  %765 = vmatprep.subr.bf16.mxu1 %v848_v1  ;;  %s764_s27 = sshll.u32 %s1105_s22, 3  ;;  %v805_v4 = vld [vmem:[%s1099_s1 + $0x20] sm:$0xff]   ;;  %v806_v5 = vld [vmem:[%s1099_s1 + $0x18] sm:$0xff]   ;;  %v807_v8 = vld [vmem:[%s1099_s1 + $0x10] sm:$0xff]  }
   0xd   : > { %458 = vmatpush1.bf16.msra.mxu0 %v802_v0  ;;  %779 = vmatpush1.bf16.msra.mxu1 %v802_v0  ;;  %s915_s7 = scalar_lea.vmem %s1098_s0, %s764_s27  ;;  %v808_v9 = vld [vmem:[%s1099_s1 + $0x8] sm:$0xff]   ;;  %v809_v10 = vld [vmem:[%s1099_s1] sm:$0xff]   ;;  %v812_v13 = vld [vmem:[%s1099_s1 + $0x58] sm:$0xff]   ;;  %v620_v33 = vshrl.u32 %v619_v31, 7  ;;  %s1017_s14 = scalar_lea.vmem %s1103_s5, %s764_s27 }
   0xe   : > { %459 = vmatprep.subr.bf16.mxu0 %v848_v1  ;;  %766 = vmatprep.subr.bf16.mxu1 %v848_v1  ;;  %v818_v6 = vld [vmem:[%s915_s7 + $0x4] ss:$8 sps:$4 sm:$0xff]   ;;  %v813_v14 = vld [vmem:[%s1099_s1 + $0x50] sm:$0xff]   ;;  %v816_v17 = vld [vmem:[%s915_s7] ss:$8 sps:$4 sm:$0xff]  }
   0xf   : > { %v821_v7 = vld [vmem:[%s915_s7 + $0x44] ss:$8 sps:$4 sm:$0xff]   ;;  %752 = vmatprep.mubr.msk.bf16.mxu0 %vm432_vm0, %v818_v6  ;;  %v819_v18 = vld [vmem:[%s915_s7 + $0x40] ss:$8 sps:$4 sm:$0xff]   ;;  %v822_v19 = vld [vmem:[%s915_s7 + $0x14] ss:$8 sps:$4 sm:$0xff]  }
  0x10   : > { %756 = vmatprep.mubr.msk.bf16.mxu1 %vm432_vm0, %v821_v7  ;;  %v810_v11 = vld [vmem:[%s1099_s1 + $0x68] sm:$0xff]   ;;  %v811_v12 = vld [vmem:[%s1099_s1 + $0x60] sm:$0xff]   ;;  %v824_v20 = vld [vmem:[%s915_s7 + $0x54] ss:$8 sps:$4 sm:$0xff]   ;;  %v621_v34 = vsub.s32 0, %v620_v33 }
  0x11   : > { %460 = vmatpush1.bf16.msra.mxu0 %v803_v2  ;;  %780 = vmatpush1.bf16.msra.mxu1 %v803_v2  ;;  %v814_v15 = vld [vmem:[%s1099_s1 + $0x48] sm:$0xff]   ;;  %v815_v16 = vld [vmem:[%s1099_s1 + $0x40] sm:$0xff]   ;;  %v826_v21 = vld [vmem:[%s915_s7 + $0x10] ss:$8 sps:$4 sm:$0xff]  }
  0x12   : > { %461 = vmatprep.subr.bf16.mxu0 %v848_v1  ;;  %767 = vmatprep.subr.bf16.mxu1 %v848_v1  ;;  %v827_v22 = vld [vmem:[%s915_s7 + $0x50] ss:$8 sps:$4 sm:$0xff]   ;;  %v828_v23 = vld [vmem:[%s915_s7 + $0x24] ss:$8 sps:$4 sm:$0xff]   ;;  %v832_v25 = vld [vmem:[%s915_s7 + $0x20] ss:$8 sps:$4 sm:$0xff]  }
  0x13   : > { %v830_v24 = vld [vmem:[%s915_s7 + $0x64] ss:$8 sps:$4 sm:$0xff]   ;;  %v833_v26 = vld [vmem:[%s915_s7 + $0x60] ss:$8 sps:$4 sm:$0xff]   ;;  %v834_v27 = vld [vmem:[%s915_s7 + $0x34] ss:$8 sps:$4 sm:$0xff]  }
  0x14   : > { %v836_v28 = vld [vmem:[%s915_s7 + $0x74] ss:$8 sps:$4 sm:$0xff]   ;;  %v838_v29 = vld [vmem:[%s915_s7 + $0x30] ss:$8 sps:$4 sm:$0xff]   ;;  %v600_v32 = vld [vmem:[%s1102_s4] sm:$0x1] }
  0x15   : > { %462 = vmatpush1.bf16.msra.mxu0 %v804_v3  ;;  %781 = vmatpush1.bf16.msra.mxu1 %v804_v3  ;;  %v839_v30 = vld [vmem:[%s915_s7 + $0x70] ss:$8 sps:$4 sm:$0xff]   ;;  %vm601_vm1 = vcmp.ne.f32.partialorder %v600_v32, 0.0  ;;  %v998_v36 = vld [vmem:[%s1100_s2] ss:$0 sm:$0xff] }
  0x16   : > { %463 = vmatprep.subr.bf16.mxu0 %v848_v1  ;;  %768 = vmatprep.subr.bf16.mxu1 %v848_v1  ;;  %v618_v35 = vsel %vm601_vm1, 1, %v848_v1  ;;  %v1003_v38 = vld [vmem:[%s1101_s3] ss:$0 sm:$0xff] }
  0x17   : > { %v1005_v39 = vrot.slane %v618_v35, %v621_v34 }
  0x19   : > { %464 = vmatpush1.bf16.msra.mxu0 %v805_v4  ;;  %782 = vmatpush1.bf16.msra.mxu1 %v805_v4  ;;  %vm623_vm2 = vcmp.eq.s32.totalorder %v1005_v39, 1 }
  0x1a   : > { %465 = vmatprep.subr.bf16.mxu0 %v848_v1  ;;  %769 = vmatprep.subr.bf16.mxu1 %v848_v1 }
  0x1d   : > { %466 = vmatpush1.bf16.msra.mxu0 %v806_v5  ;;  %783 = vmatpush1.bf16.msra.mxu1 %v806_v5 }
  0x1e   : > { %467 = vmatprep.subr.bf16.mxu0 %v848_v1  ;;  %770 = vmatprep.subr.bf16.mxu1 %v848_v1 }
  0x21   : > { %468 = vmatpush1.bf16.msra.mxu0 %v807_v8  ;;  %784 = vmatpush1.bf16.msra.mxu1 %v807_v8 }
  0x22   : > { %469 = vmatprep.subr.bf16.mxu0 %v848_v1  ;;  %771 = vmatprep.subr.bf16.mxu1 %v848_v1 }
  0x25   : > { %470 = vmatpush1.bf16.msra.mxu0 %v808_v9  ;;  %785 = vmatpush1.bf16.msra.mxu1 %v808_v9 }
  0x26   : > { %471 = vmatprep.subr.bf16.mxu0 %v848_v1  ;;  %772 = vmatprep.subr.bf16.mxu1 %v848_v1 }
  0x29   : > { %472 = vmatpush1.bf16.msra.mxu0 %v809_v10  ;;  %786 = vmatpush1.bf16.msra.mxu1 %v809_v10 }
  0x2a   : > { %477 = vmatprep.subr.bf16.mxu0 %v848_v1  ;;  %773 = vmatprep.subr.bf16.mxu1 %v848_v1 }
  0x2d   : > { %478 = vmatpush2.bf16.msra.mxu0 %v810_v11  ;;  %787 = vmatpush2.bf16.msra.mxu1 %v810_v11 }
  0x2e   : > { %479 = vmatprep.subr.bf16.mxu0 %v848_v1  ;;  %774 = vmatprep.subr.bf16.mxu1 %v848_v1 }
  0x31   : > { %480 = vmatpush2.bf16.msra.mxu0 %v811_v12  ;;  %788 = vmatpush2.bf16.msra.mxu1 %v811_v12 }
  0x32   : > { %481 = vmatprep.subr.bf16.mxu0 %v848_v1  ;;  %775 = vmatprep.subr.bf16.mxu1 %v848_v1 }
  0x35   : > { %482 = vmatpush2.bf16.msra.mxu0 %v812_v13  ;;  %789 = vmatpush2.bf16.msra.mxu1 %v812_v13 }
  0x36   : > { %483 = vmatprep.subr.bf16.mxu0 %v848_v1  ;;  %776 = vmatprep.subr.bf16.mxu1 %v848_v1 }
  0x39   : > { %484 = vmatpush2.bf16.msra.mxu0 %v813_v14  ;;  %790 = vmatpush2.bf16.msra.mxu1 %v813_v14 }
  0x3a   : > { %485 = vmatprep.subr.bf16.mxu0 %v848_v1  ;;  %777 = vmatprep.subr.bf16.mxu1 %v848_v1 }
  0x3d   : > { %486 = vmatpush2.bf16.msra.mxu0 %v814_v15  ;;  %791 = vmatpush2.bf16.msra.mxu1 %v814_v15 }
  0x3e   : > { %487 = vmatprep.subr.bf16.mxu0 %v848_v1  ;;  %778 = vmatprep.subr.bf16.mxu1 %v848_v1 }
  0x41   : > { %488 = vmatpush2.bf16.msra.mxu0 %v815_v16  ;;  %792 = vmatpush2.bf16.msra.mxu1 %v815_v16 }
  0x44   : > { %490 = vmatmul.mubr.bf16.vlgmr.msra.gmra.mxu0 %v816_v17  ;;  %522 = vmatmul.mubr.bf16.vlgmr.msra.gmra.mxu1 %v819_v18 }
  0x45   : > { %753 = vmatprep.mubr.msk.bf16.mxu0 %vm432_vm0, %v822_v19  ;;  %757 = vmatprep.mubr.msk.bf16.mxu1 %vm432_vm0, %v824_v20 }
  0x4c   : > { %498 = vmatmul.mubr.bf16.gmra.mxu0 %v826_v21  ;;  %530 = vmatmul.mubr.bf16.gmra.mxu1 %v827_v22 }
  0x4d   : > { %754 = vmatprep.mubr.msk.bf16.mxu0 %vm432_vm0, %v828_v23  ;;  %758 = vmatprep.mubr.msk.bf16.mxu1 %vm432_vm0, %v830_v24 }
  0x54   : > { %506 = vmatmul.mubr.bf16.gmra.mxu0 %v832_v25  ;;  %538 = vmatmul.mubr.bf16.gmra.mxu1 %v833_v26 }
  0x55   : > { %755 = vmatprep.mubr.msk.bf16.mxu0 %vm432_vm0, %v834_v27  ;;  %759 = vmatprep.mubr.msk.bf16.mxu1 %vm432_vm0, %v836_v28 }
  0x5c   : > { %514 = vmatmul.mubr.bf16.gmra.mxu0 %v838_v29  ;;  %546 = vmatmul.mubr.bf16.gmra.mxu1 %v839_v30 }
 0x104   : > { %v491_v37 = vpop.f32.mrf.mxu0  ;;  %v523_v40 = vpop.f32.mrf.mxu1 }
 0x105   : > { %v561_v41 = vmul.f32 %v998_v36, %v491_v37  ;;  %v569_v42 = vmul.f32 %v998_v36, %v523_v40 }
 0x106   : > { %v493_v43 = vpop.f32.mrf.mxu0  ;;  %v525_v44 = vpop.f32.mrf.mxu1 }
 0x107   : > { %v584_v45 = vadd.f32 %v1003_v38, %v561_v41  ;;  %v592_v46 = vadd.f32 %v1003_v38, %v569_v42 }
 0x108   : > { %v494_v47 = vpop.f32.mrf.mxu0  ;;  %v526_v48 = vpop.f32.mrf.mxu1 }
 0x109   : > { %v602_v49 = vmax.f32 %v584_v45, 0.0  ;;  %v610_v50 = vmax.f32 %v592_v46, 0.0  ;;  %v562_v51 = vmul.f32 %v998_v36, %v494_v47  ;;  %v570_v52 = vmul.f32 %v998_v36, %v526_v48 }
 0x10a   : > { %v496_v53 = vpop.f32.mrf.mxu0  ;;  %v528_v54 = vpop.f32.mrf.mxu1 }
 0x10b   : > { %v624_v55 = vsel %vm623_vm2, %v602_v49, %v584_v45  ;;  %v632_v56 = vsel %vm623_vm2, %v610_v50, %v592_v46  ;;  %v585_v57 = vadd.f32 %v1003_v38, %v562_v51  ;;  %v593_v58 = vadd.f32 %v1003_v38, %v570_v52 }
 0x10c   : > { %640 = vst [vmem:[%s1017_s14] sm:$0xff] %v624_v55  ;;  %648 = vst [vmem:[%s1017_s14 + $0x40] sm:$0xff] %v632_v56  ;;  %v499_v59 = vpop.f32.mrf.mxu0  ;;  %v531_v60 = vpop.f32.mrf.mxu1 }
 0x10d   : > { %v603_v61 = vmax.f32 %v585_v57, 0.0  ;;  %v611_v62 = vmax.f32 %v593_v58, 0.0  ;;  %v563_v63 = vmul.f32 %v998_v36, %v499_v59  ;;  %v571_v0 = vmul.f32 %v998_v36, %v531_v60 }
 0x10e   : > { %v501_v1 = vpop.f32.mrf.mxu0  ;;  %v533_v2 = vpop.f32.mrf.mxu1 }
 0x10f   : > { %v625_v3 = vsel %vm623_vm2, %v603_v61, %v585_v57  ;;  %v633_v4 = vsel %vm623_vm2, %v611_v62, %v593_v58  ;;  %v586_v5 = vadd.f32 %v1003_v38, %v563_v63  ;;  %v594_v6 = vadd.f32 %v1003_v38, %v571_v0 }
 0x110   : > { %641 = vst [vmem:[%s1017_s14 + $0x8] sm:$0xff] %v625_v3  ;;  %649 = vst [vmem:[%s1017_s14 + $0x48] sm:$0xff] %v633_v4  ;;  %v502_v7 = vpop.f32.mrf.mxu0  ;;  %v534_v8 = vpop.f32.mrf.mxu1 }
 0x111   : > { %v604_v9 = vmax.f32 %v586_v5, 0.0  ;;  %v612_v10 = vmax.f32 %v594_v6, 0.0  ;;  %v564_v11 = vmul.f32 %v998_v36, %v502_v7  ;;  %v572_v12 = vmul.f32 %v998_v36, %v534_v8 }
 0x112   : > { %v504_v13 = vpop.f32.mrf.mxu0  ;;  %v536_v14 = vpop.f32.mrf.mxu1 }
 0x113   : > { %v626_v15 = vsel %vm623_vm2, %v604_v9, %v586_v5  ;;  %v634_v16 = vsel %vm623_vm2, %v612_v10, %v594_v6  ;;  %v587_v17 = vadd.f32 %v1003_v38, %v564_v11  ;;  %v595_v18 = vadd.f32 %v1003_v38, %v572_v12 }
 0x114   : > { %642 = vst [vmem:[%s1017_s14 + $0x10] sm:$0xff] %v626_v15  ;;  %650 = vst [vmem:[%s1017_s14 + $0x50] sm:$0xff] %v634_v16  ;;  %v507_v19 = vpop.f32.mrf.mxu0  ;;  %v539_v20 = vpop.f32.mrf.mxu1 }
 0x115   : > { %v605_v21 = vmax.f32 %v587_v17, 0.0  ;;  %v613_v22 = vmax.f32 %v595_v18, 0.0  ;;  %v565_v23 = vmul.f32 %v998_v36, %v507_v19  ;;  %v573_v24 = vmul.f32 %v998_v36, %v539_v20 }
 0x116   : > { %v509_v25 = vpop.f32.mrf.mxu0  ;;  %v541_v26 = vpop.f32.mrf.mxu1 }
 0x117   : > { %v627_v27 = vsel %vm623_vm2, %v605_v21, %v587_v17  ;;  %v635_v28 = vsel %vm623_vm2, %v613_v22, %v595_v18  ;;  %v588_v29 = vadd.f32 %v1003_v38, %v565_v23  ;;  %v596_v30 = vadd.f32 %v1003_v38, %v573_v24 }
 0x118   : > { %643 = vst [vmem:[%s1017_s14 + $0x18] sm:$0xff] %v627_v27  ;;  %651 = vst [vmem:[%s1017_s14 + $0x58] sm:$0xff] %v635_v28  ;;  %v510_v31 = vpop.f32.mrf.mxu0  ;;  %v542_v32 = vpop.f32.mrf.mxu1 }
 0x119   : > { %v606_v33 = vmax.f32 %v588_v29, 0.0  ;;  %v614_v34 = vmax.f32 %v596_v30, 0.0  ;;  %v566_v35 = vmul.f32 %v998_v36, %v510_v31  ;;  %v574_v37 = vmul.f32 %v998_v36, %v542_v32 }
 0x11a   : > { %v512_v40 = vpop.f32.mrf.mxu0  ;;  %v544_v41 = vpop.f32.mrf.mxu1 }
 0x11b   : > { %v628_v42 = vsel %vm623_vm2, %v606_v33, %v588_v29  ;;  %v636_v43 = vsel %vm623_vm2, %v614_v34, %v596_v30  ;;  %v589_v44 = vadd.f32 %v1003_v38, %v566_v35  ;;  %v597_v45 = vadd.f32 %v1003_v38, %v574_v37 }
 0x11c   : > { %644 = vst [vmem:[%s1017_s14 + $0x20] sm:$0xff] %v628_v42  ;;  %652 = vst [vmem:[%s1017_s14 + $0x60] sm:$0xff] %v636_v43  ;;  %v515_v46 = vpop.f32.mrf.mxu0  ;;  %v547_v47 = vpop.f32.mrf.mxu1 }
 0x11d   : > { %v607_v48 = vmax.f32 %v589_v44, 0.0  ;;  %v615_v49 = vmax.f32 %v597_v45, 0.0  ;;  %v567_v50 = vmul.f32 %v998_v36, %v515_v46  ;;  %v575_v51 = vmul.f32 %v998_v36, %v547_v47 }
 0x11e   : > { %v517_v52 = vpop.f32.mrf.mxu0  ;;  %v549_v53 = vpop.f32.mrf.mxu1 }
 0x11f   : > { %v629_v54 = vsel %vm623_vm2, %v607_v48, %v589_v44  ;;  %v637_v55 = vsel %vm623_vm2, %v615_v49, %v597_v45  ;;  %v590_v56 = vadd.f32 %v1003_v38, %v567_v50  ;;  %v598_v57 = vadd.f32 %v1003_v38, %v575_v51 }
 0x120   : > { %645 = vst [vmem:[%s1017_s14 + $0x28] sm:$0xff] %v629_v54  ;;  %653 = vst [vmem:[%s1017_s14 + $0x68] sm:$0xff] %v637_v55  ;;  %v518_v58 = vpop.f32.mrf.mxu0  ;;  %v550_v59 = vpop.f32.mrf.mxu1 }
 0x121   : > { %v608_v60 = vmax.f32 %v590_v56, 0.0  ;;  %v616_v61 = vmax.f32 %v598_v57, 0.0  ;;  %v568_v62 = vmul.f32 %v998_v36, %v518_v58  ;;  %v576_v63 = vmul.f32 %v998_v36, %v550_v59 }
 0x122   : > { %v520_v0 = vpop.f32.mrf.mxu0  ;;  %v552_v1 = vpop.f32.mrf.mxu1 }
 0x123   : > { %v630_v2 = vsel %vm623_vm2, %v608_v60, %v590_v56  ;;  %v638_v3 = vsel %vm623_vm2, %v616_v61, %v598_v57  ;;  %v591_v4 = vadd.f32 %v1003_v38, %v568_v62  ;;  %v599_v5 = vadd.f32 %v1003_v38, %v576_v63 }
 0x124   : > { %646 = vst [vmem:[%s1017_s14 + $0x30] sm:$0xff] %v630_v2  ;;  %654 = vst [vmem:[%s1017_s14 + $0x70] sm:$0xff] %v638_v3 }
 0x125   : > { %v609_v6 = vmax.f32 %v591_v4, 0.0  ;;  %v617_v7 = vmax.f32 %v599_v5, 0.0 }
 0x127   : > { %v631_v8 = vsel %vm623_vm2, %v609_v6, %v591_v4  ;;  %v639_v36 = vsel %vm623_vm2, %v617_v7, %v599_v5 }
 0x128   : > { %647 = vst [vmem:[%s1017_s14 + $0x38] sm:$0xff] %v631_v8  ;;  %655 = vst [vmem:[%s1017_s14 + $0x78] sm:$0xff] %v639_v36 }
 0x129 PF: > { %s15_s18 = sadd.s32 1, %s846_s18  }
 0x12a   : > { %p12_p4 = scmp.ge.s32.totalorder %s15_s18, 6  }
 0x12c   :  { %14 = sbr.rel (!%p12_p4) target bundleno = 1 (0x1), region = 70 }

</bundles_post_ra>
